<compile_context>
chip_gen: v6e
topology: v6e:2x2x1
jax: 0.10.0
libtpu: 0.0.40
codegen_flags: <defaults>
</compile_context>

<pallas_src>
import functools

import jax
import jax.numpy as jnp
from jax.experimental import pallas as pl
from jax.experimental.pallas import tpu as pltpu


def _round_up(a, b):
    return (a + b - 1) // b * b


def _physical_vmem_bytes():
    default = 128 * 1024 * 1024
    try:
        info = pltpu.get_tpu_info()
    except Exception:
        return default
    for attr in ("vmem_capacity_bytes", "vmem_size_bytes", "vmem_bytes"):
        v = getattr(info, attr, None)
        if isinstance(v, int) and v > 0:
            return v
    return default


def _mha_kernel(x_ref, y_ref, wq_ref, bq_ref, wkv_ref, bkv_ref, wp_ref, bp_ref,
                *refs, num_heads, head_dim, with_attn):
    """One grid step = one (batch element, query tile)."""
    if with_attn:
        out_ref, attn_ref, k_scr, v_scr, q_scr, o_scr = refs
    else:
        out_ref, k_scr, v_scr, q_scr, o_scr = refs
        attn_ref = None

    h, d = num_heads, head_dim
    c = h * d
    f32, bf16 = jnp.float32, jnp.bfloat16
    qi = pl.program_id(1)

    # ---- K/V projection: once per batch element (hoisted out of the query
    # ---- axis; grid axis 1 is "arbitrary" so the scratch carries across qi).
    @pl.when(qi == 0)
    def _():
        y = y_ref[0]                                                  # (m, d_ref) bf16
        # Lane-dense N=c matmuls; keys and values done separately so only one
        # (m, c) f32 temporary is live at a time.
        k2d = (jnp.dot(y, wkv_ref[:, :c], preferred_element_type=f32)
               + bkv_ref[:, :c]).astype(bf16)                         # (m, c)
        for hh in range(h):                                           # lane-slice copies
            k_scr[hh] = k2d[:, hh * d:(hh + 1) * d]
        v2d = (jnp.dot(y, wkv_ref[:, c:], preferred_element_type=f32)
               + bkv_ref[:, c:]).astype(bf16)                         # (m, c)
        for hh in range(h):
            v_scr[hh] = v2d[:, hh * d:(hh + 1) * d]

    # ---- Q projection: one lane-dense (tq,c)@(c,c); softmax scale folded
    # ---- into Wq/bq on the host.
    x = x_ref[0]                                                      # (tq, c) bf16
    q2d = (jnp.dot(x, wq_ref[...], preferred_element_type=f32)
           + bq_ref[...]).astype(bf16)                                # (tq, c)
    for hh in range(h):                                               # head-split copies
        q_scr[hh] = q2d[:, hh * d:(hh + 1) * d]

    # ---- Scores + softmax (f32, keys on lanes), heads batched on leading dim.
    q = q_scr[...]                                                    # (h, tq, d) bf16
    k = k_scr[...]                                                    # (h, m,  d) bf16
    s = jax.lax.dot_general(q, k, (((2,), (2,)), ((0,), (0,))),
                            preferred_element_type=f32)               # (h, tq, m)
    s = s - jnp.max(s, axis=-1, keepdims=True)
    p = jnp.exp(s)
    l = jnp.sum(p, axis=-1, keepdims=True)
    p = p * (1.0 / l)            # exact reciprocal: only O(h*tq) divides
    p_bf = p.astype(bf16)

    if attn_ref is not None:
        attn_ref[0] = p_bf                                            # (h, tq, m) bf16

    # ---- P @ V (heads batched), then fuse heads back onto the lane dim.
    v = v_scr[...]                                                    # (h, m, d) bf16
    o = jax.lax.dot_general(p_bf, v, (((2,), (1,)), ((0,), (0,))),
                            preferred_element_type=f32)               # (h, tq, d)
    for hh in range(h):
        o_scr[:, hh * d:(hh + 1) * d] = o[hh].astype(bf16)            # (tq, c)

    # ---- Output projection: one lane-dense (tq,c)@(c,c), K = c (full depth).
    out2d = jnp.dot(o_scr[...], wp_ref[...], preferred_element_type=f32) + bp_ref[...]
    out_ref[0] = out2d.astype(out_ref.dtype)


def multi_head_attention(x, y, params, num_heads, *, return_attention=True,
                         attention_layout="bhnm"):
    """Pallas MHA forward.

    Returns (out, attention). `attention` is bf16 in (b, h, n, m) layout by
    default (pass attention_layout="bnmh" for the PyTorch (b, n, m, h) layout,
    at the cost of one extra HBM round trip); None if return_attention=False.
    """
    y = x if y is None else y
    b, n, c = x.shape
    _, m, d_ref = y.shape
    h = num_heads
    assert c % h == 0, "dim_self must be divisible by num_heads"
    d = c // h
    scale = float(d) ** (-0.5)
    out_itemsize = jnp.dtype(x.dtype).itemsize

    wq, bq, wkv, bkv, wp, bp = params

    # ---- Host-side weight prep (PyTorch Linear weight is (out, in)). --------
    wq_b = (wq.T * scale).astype(jnp.bfloat16)                 # (c, c), scale folded in
    bq_b = (bq * scale).reshape(1, c).astype(jnp.float32)
    wkv_b = wkv.T.astype(jnp.bfloat16)                         # (d_ref, 2c), cols = (kv, head, d)
    bkv_b = bkv.reshape(1, 2 * c).astype(jnp.float32)
    wp_b = wp.T.astype(jnp.bfloat16)                           # (c, c)
    bp_b = bp.reshape(1, c).astype(jnp.float32)

    x_b = x.astype(jnp.bfloat16)
    y_b = y.astype(jnp.bfloat16)

    # ---- VMEM budgeting & query-tile selection. ------------------------------
    phys_vmem = _physical_vmem_bytes()

    def step_vmem(tq_):
        attn_tile = 2 * h * tq_ * m * 2 if return_attention else 0
        return int(
            2 * (tq_ * c * 2 + m * d_ref * 2 + tq_ * c * out_itemsize) + attn_tile  # I/O tiles (dbl buf)
            + 2 * (2 * (c * c + d_ref * 2 * c + c * c) + 4 * (c + 2 * c + c))       # weights (dbl buf)
            + 2 * (2 * h * m * d + h * tq_ * d + tq_ * c)                            # persistent scratch
            + m * c * 4 + tq_ * c * 4 + 2 * h * tq_ * m * 4                          # f32 temporaries
            + h * tq_ * d * 4 + tq_ * c * 4)

    if n <= 128:
        tq = _round_up(n, 8)
    else:
        tq = 128
        for cand in (512, 256):  # bigger tiles when VMEM allows and padding waste is small
            if _round_up(n, cand) - n <= cand // 8 and step_vmem(cand) <= int(0.45 * phys_vmem):
                tq = cand
                break
    n_pad = _round_up(n, tq)
    if n_pad != n:
        x_b = jnp.pad(x_b, ((0, 0), (0, n_pad - n), (0, 0)))
    grid = (b, n_pad // tq)

    est = int(1.25 * step_vmem(tq))
    vmem_limit = min(max(est, 32 * 1024 * 1024),
                     (phys_vmem * 7) // 8,
                     112 * 1024 * 1024)

    # ---- Cost estimate (KV projection counted once per batch, as executed). --
    flops = (2 * b * n_pad * c * c            # Q projection
             + 2 * b * m * d_ref * 2 * c      # KV projection (once per batch)
             + 2 * b * h * n_pad * m * d      # Q K^T
             + 2 * b * h * n_pad * m * d      # P V
             + 2 * b * n_pad * c * c)         # output projection
    transcendentals = b * h * n_pad * m
    bytes_accessed = (x_b.size * 2 + y_b.size * 2
                      + 2 * (wq_b.size + wkv_b.size + wp_b.size)
                      + 4 * (bq_b.size + bkv_b.size + bp_b.size)
                      + b * n_pad * c * out_itemsize
                      + (b * h * n_pad * m * 2 if return_attention else 0))

    kernel = functools.partial(_mha_kernel, num_heads=h, head_dim=d,
                               with_attn=return_attention)

    out_shape = [jax.ShapeDtypeStruct((b, n_pad, c), x.dtype)]
    out_specs = [pl.BlockSpec((1, tq, c), lambda bi, qi: (bi, qi, 0))]
    if return_attention:
        out_shape.append(jax.ShapeDtypeStruct((b, h, n_pad, m), jnp.bfloat16))
        out_specs.append(pl.BlockSpec((1, h, tq, m), lambda bi, qi: (bi, 0, qi, 0)))

    results = pl.pallas_call(
        kernel,
        out_shape=tuple(out_shape),
        grid=grid,
        in_specs=[
            pl.BlockSpec((1, tq, c), lambda bi, qi: (bi, qi, 0)),        # x tile
            pl.BlockSpec((1, m, d_ref), lambda bi, qi: (bi, 0, 0)),      # y (per batch)
            pl.BlockSpec((c, c), lambda bi, qi: (0, 0)),                 # Wq
            pl.BlockSpec((1, c), lambda bi, qi: (0, 0)),                 # bq
            pl.BlockSpec((d_ref, 2 * c), lambda bi, qi: (0, 0)),         # Wkv
            pl.BlockSpec((1, 2 * c), lambda bi, qi: (0, 0)),             # bkv
            pl.BlockSpec((c, c), lambda bi, qi: (0, 0)),                 # Wp
            pl.BlockSpec((1, c), lambda bi, qi: (0, 0)),                 # bp
        ],
        out_specs=tuple(out_specs),
        scratch_shapes=[
            pltpu.VMEM((h, m, d), jnp.bfloat16),    # K (head-split), lives across qi
            pltpu.VMEM((h, m, d), jnp.bfloat16),    # V (head-split), lives across qi
            pltpu.VMEM((h, tq, d), jnp.bfloat16),   # Q head-split staging
            pltpu.VMEM((tq, c), jnp.bfloat16),      # PV result, heads fused on lanes
        ],
        compiler_params=pltpu.CompilerParams(
            # batch axis megacore-parallel; query axis sequential because the
            # K/V scratch computed at qi == 0 is reused by later query tiles.
            dimension_semantics=("parallel", "arbitrary"),
            vmem_limit_bytes=int(vmem_limit),
        ),
        cost_estimate=pl.CostEstimate(
            flops=int(flops),
            transcendentals=int(transcendentals),
            bytes_accessed=int(bytes_accessed),
        ),
    )(x_b, y_b, wq_b, bq_b, wkv_b, bkv_b, wp_b, bp_b)

    if return_attention:
        out, attn = results
    else:
        out = results[0] if isinstance(results, (tuple, list)) else results
        attn = None

    if n_pad != n:
        out = out[:, :n, :]
        if attn is not None:
            attn = attn[:, :, :n, :]
    if attn is not None and attention_layout == "bnmh":
        attn = jnp.transpose(attn, (0, 2, 3, 1))   # PyTorch layout, extra HBM pass
    return out, attn


def reference_forward(x, y, params, num_heads):
    """Pure-JAX (f32) reference mirroring the PyTorch forward exactly."""
    wq, bq, wkv, bkv, wp, bp = params
    b, n, c = x.shape
    _, m, _ = y.shape
    hd = c // num_heads
    scale = float(hd) ** (-0.5)
    q = (x @ wq.T + bq).reshape(b, n, num_heads, hd)
    kv = (y @ wkv.T + bkv).reshape(b, m, 2, num_heads, hd)
    k, v = kv[:, :, 0], kv[:, :, 1]
    att = jnp.einsum('bnhd,bmhd->bnmh', q, k) * scale
    att = jax.nn.softmax(att, axis=2)
    out = jnp.einsum('bnmh,bmhd->bnhd', att, v).reshape(b, n, c)
    out = out @ wp.T + bp
    return out, att


if __name__ == "__main__":
    # Small, deterministic setup consistent with the module's __init__.
    batch, seq, dim_self, dim_ref, num_heads = 2, 8, 32, 32, 4

    key = jax.random.PRNGKey(0)
    k_x, k_wq, k_bq, k_wkv, k_bkv, k_wp, k_bp = jax.random.split(key, 7)

    x = jax.random.normal(k_x, (batch, seq, dim_self), jnp.float32)

    # Deterministic synthetic parameters (PyTorch Linear convention: W is (out, in)).
    wq = 0.1 * jax.random.normal(k_wq, (dim_self, dim_self), jnp.float32)
    bq = 0.1 * jax.random.normal(k_bq, (dim_self,), jnp.float32)
    wkv = 0.1 * jax.random.normal(k_wkv, (2 * dim_self, dim_ref), jnp.float32)
    bkv = 0.1 * jax.random.normal(k_bkv, (2 * dim_self,), jnp.float32)
    wp = 0.1 * jax.random.normal(k_wp, (dim_self, dim_self), jnp.float32)
    bp = 0.1 * jax.random.normal(k_bp, (dim_self,), jnp.float32)

    params = (wq, bq, wkv, bkv, wp, bp)

    # Self-attention path (y=None in the PyTorch module => y = x).
    out, attn = multi_head_attention(x, None, params, num_heads)
    out, attn = jax.block_until_ready((out, attn))

    # Correctness check against a pure-JAX f32 reference (kernel matmuls in bf16,
    # attention probabilities stored in bf16).
    out_ref, attn_ref_bnmh = reference_forward(x, x, params, num_heads)
    attn_ref_bhnm = jnp.transpose(attn_ref_bnmh, (0, 3, 1, 2))

    assert out.shape == (batch, seq, dim_self)
    assert attn.shape == (batch, num_heads, seq, seq)
    assert jnp.allclose(out, out_ref, rtol=2e-2, atol=2e-2), "output mismatch"
    assert jnp.allclose(attn.astype(jnp.float32), attn_ref_bhnm,
                        rtol=2e-2, atol=2e-2), "attention mismatch"

    print("KERNEL_OK")
</pallas_src>

<mosaic_0001>
module attributes {stable_mosaic.version = 11 : i64} {
  func.func @_mha_kernel(%arg0: i32, %arg1: i32, %arg2: memref<1x8x32xbf16, #tpu.memory_space<vmem>>, %arg3: memref<1x8x32xbf16, #tpu.memory_space<vmem>>, %arg4: memref<32x32xbf16, #tpu.memory_space<vmem>>, %arg5: memref<1x32xf32, #tpu.memory_space<vmem>>, %arg6: memref<32x64xbf16, #tpu.memory_space<vmem>>, %arg7: memref<1x64xf32, #tpu.memory_space<vmem>>, %arg8: memref<32x32xbf16, #tpu.memory_space<vmem>>, %arg9: memref<1x32xf32, #tpu.memory_space<vmem>>, %arg10: memref<1x8x32xf32, #tpu.memory_space<vmem>>, %arg11: memref<1x4x8x8xbf16, #tpu.memory_space<vmem>>, %arg12: memref<4x8x8xbf16, #tpu.memory_space<vmem>>, %arg13: memref<4x8x8xbf16, #tpu.memory_space<vmem>>, %arg14: memref<4x8x8xbf16, #tpu.memory_space<vmem>>, %arg15: memref<8x32xbf16, #tpu.memory_space<vmem>>) attributes {dimension_semantics = [#tpu.dimension_semantics<parallel>, #tpu.dimension_semantics<arbitrary>], iteration_bounds = array<i64: 2, 1>, scalar_prefetch = 0 : i64, scratch_operands = 4 : i64, tpu.core_type = #tpu.core_type<tc>, window_params = [{transform_indices = @transform_0, window_bounds = array<i64: 1, 8, 32>}, {transform_indices = @transform_1, window_bounds = array<i64: 1, 8, 32>}, {pipeline_mode = #tpu.pipeline_mode<synchronous>, transform_indices = @transform_2, window_bounds = array<i64: 32, 32>}, {pipeline_mode = #tpu.pipeline_mode<synchronous>, transform_indices = @transform_3, window_bounds = array<i64: 1, 32>}, {pipeline_mode = #tpu.pipeline_mode<synchronous>, transform_indices = @transform_4, window_bounds = array<i64: 32, 64>}, {pipeline_mode = #tpu.pipeline_mode<synchronous>, transform_indices = @transform_5, window_bounds = array<i64: 1, 64>}, {pipeline_mode = #tpu.pipeline_mode<synchronous>, transform_indices = @transform_6, window_bounds = array<i64: 32, 32>}, {pipeline_mode = #tpu.pipeline_mode<synchronous>, transform_indices = @transform_7, window_bounds = array<i64: 1, 32>}, {transform_indices = @transform_8, window_bounds = array<i64: 1, 8, 32>}, {transform_indices = @transform_9, window_bounds = array<i64: 1, 4, 8, 8>}]} {
    %c0_i32 = arith.constant 0 : i32
    %0 = arith.cmpi eq, %arg1, %c0_i32 : i32
    %1 = arith.extui %0 : i1 to i32
    %c0_i32_0 = arith.constant 0 : i32
    %2 = arith.cmpi ne, %1, %c0_i32_0 : i32
    scf.if %2 {
      %c0_49 = arith.constant 0 : index
      %c0_50 = arith.constant 0 : index
      %c0_51 = arith.constant 0 : index
      %72 = vector.load %arg3[%c0_49, %c0_50, %c0_51] : memref<1x8x32xbf16, #tpu.memory_space<vmem>>, vector<1x8x32xbf16>
      %73 = vector.shape_cast %72 : vector<1x8x32xbf16> to vector<8x32xbf16>
      %c0_52 = arith.constant 0 : index
      %c0_53 = arith.constant 0 : index
      %74 = vector.load %arg6[%c0_52, %c0_53] : memref<32x64xbf16, #tpu.memory_space<vmem>>, vector<32x32xbf16>
      %cst_54 = arith.constant dense<0.000000e+00> : vector<8x32xf32>
      %75 = tpu.matmul %73, %74, %cst_54 {dimension_numbers = #tpu.dot_dimension_numbers<[1], [0], [0], [1], [0, 0, 1, 1], [], []>} : vector<8x32xbf16>, vector<32x32xbf16>, vector<8x32xf32> -> vector<8x32xf32>
      %c0_55 = arith.constant 0 : index
      %c0_56 = arith.constant 0 : index
      %76 = vector.load %arg7[%c0_55, %c0_56] : memref<1x64xf32, #tpu.memory_space<vmem>>, vector<1x32xf32>
      %77 = vector.broadcast %76 : vector<1x32xf32> to vector<8x32xf32>
      %78 = arith.addf %75, %77 : vector<8x32xf32>
      %79 = arith.truncf %78 : vector<8x32xf32> to vector<8x32xbf16>
      %80 = vector.extract_strided_slice %79 {offsets = [0, 0], sizes = [8, 8], strides = [1, 1]} : vector<8x32xbf16> to vector<8x8xbf16>
      %c0_57 = arith.constant 0 : index
      %c0_58 = arith.constant 0 : index
      %c0_59 = arith.constant 0 : index
      %81 = vector.load %arg12[%c0_57, %c0_58, %c0_59] : memref<4x8x8xbf16, #tpu.memory_space<vmem>>, vector<1x8x8xbf16>
      %82 = vector.shape_cast %81 : vector<1x8x8xbf16> to vector<8x8xbf16>
      %83 = vector.shape_cast %80 : vector<8x8xbf16> to vector<1x8x8xbf16>
      tpu.vector_store %arg12[%c0_57, %c0_58, %c0_59], %83 {strides = array<i32>} : memref<4x8x8xbf16, #tpu.memory_space<vmem>>, vector<1x8x8xbf16>,
      %84 = vector.extract_strided_slice %79 {offsets = [0, 8], sizes = [8, 8], strides = [1, 1]} : vector<8x32xbf16> to vector<8x8xbf16>
      %c1_60 = arith.constant 1 : index
      %c0_61 = arith.constant 0 : index
      %c0_62 = arith.constant 0 : index
      %85 = vector.load %arg12[%c1_60, %c0_61, %c0_62] : memref<4x8x8xbf16, #tpu.memory_space<vmem>>, vector<1x8x8xbf16>
      %86 = vector.shape_cast %85 : vector<1x8x8xbf16> to vector<8x8xbf16>
      %87 = vector.shape_cast %84 : vector<8x8xbf16> to vector<1x8x8xbf16>
      tpu.vector_store %arg12[%c1_60, %c0_61, %c0_62], %87 {strides = array<i32>} : memref<4x8x8xbf16, #tpu.memory_space<vmem>>, vector<1x8x8xbf16>,
      %88 = vector.extract_strided_slice %79 {offsets = [0, 16], sizes = [8, 8], strides = [1, 1]} : vector<8x32xbf16> to vector<8x8xbf16>
      %c2_63 = arith.constant 2 : index
      %c0_64 = arith.constant 0 : index
      %c0_65 = arith.constant 0 : index
      %89 = vector.load %arg12[%c2_63, %c0_64, %c0_65] : memref<4x8x8xbf16, #tpu.memory_space<vmem>>, vector<1x8x8xbf16>
      %90 = vector.shape_cast %89 : vector<1x8x8xbf16> to vector<8x8xbf16>
      %91 = vector.shape_cast %88 : vector<8x8xbf16> to vector<1x8x8xbf16>
      tpu.vector_store %arg12[%c2_63, %c0_64, %c0_65], %91 {strides = array<i32>} : memref<4x8x8xbf16, #tpu.memory_space<vmem>>, vector<1x8x8xbf16>,
      %92 = vector.extract_strided_slice %79 {offsets = [0, 24], sizes = [8, 8], strides = [1, 1]} : vector<8x32xbf16> to vector<8x8xbf16>
      %c3_66 = arith.constant 3 : index
      %c0_67 = arith.constant 0 : index
      %c0_68 = arith.constant 0 : index
      %93 = vector.load %arg12[%c3_66, %c0_67, %c0_68] : memref<4x8x8xbf16, #tpu.memory_space<vmem>>, vector<1x8x8xbf16>
      %94 = vector.shape_cast %93 : vector<1x8x8xbf16> to vector<8x8xbf16>
      %95 = vector.shape_cast %92 : vector<8x8xbf16> to vector<1x8x8xbf16>
      tpu.vector_store %arg12[%c3_66, %c0_67, %c0_68], %95 {strides = array<i32>} : memref<4x8x8xbf16, #tpu.memory_space<vmem>>, vector<1x8x8xbf16>,
      %c0_69 = arith.constant 0 : index
      %c32 = arith.constant 32 : index
      %96 = vector.load %arg6[%c0_69, %c32] : memref<32x64xbf16, #tpu.memory_space<vmem>>, vector<32x32xbf16>
      %cst_70 = arith.constant dense<0.000000e+00> : vector<8x32xf32>
      %97 = tpu.matmul %73, %96, %cst_70 {dimension_numbers = #tpu.dot_dimension_numbers<[1], [0], [0], [1], [0, 0, 1, 1], [], []>} : vector<8x32xbf16>, vector<32x32xbf16>, vector<8x32xf32> -> vector<8x32xf32>
      %c0_71 = arith.constant 0 : index
      %c32_72 = arith.constant 32 : index
      %98 = vector.load %arg7[%c0_71, %c32_72] : memref<1x64xf32, #tpu.memory_space<vmem>>, vector<1x32xf32>
      %99 = vector.broadcast %98 : vector<1x32xf32> to vector<8x32xf32>
      %100 = arith.addf %97, %99 : vector<8x32xf32>
      %101 = arith.truncf %100 : vector<8x32xf32> to vector<8x32xbf16>
      %102 = vector.extract_strided_slice %101 {offsets = [0, 0], sizes = [8, 8], strides = [1, 1]} : vector<8x32xbf16> to vector<8x8xbf16>
      %c0_73 = arith.constant 0 : index
      %c0_74 = arith.constant 0 : index
      %c0_75 = arith.constant 0 : index
      %103 = vector.load %arg13[%c0_73, %c0_74, %c0_75] : memref<4x8x8xbf16, #tpu.memory_space<vmem>>, vector<1x8x8xbf16>
      %104 = vector.shape_cast %103 : vector<1x8x8xbf16> to vector<8x8xbf16>
      %105 = vector.shape_cast %102 : vector<8x8xbf16> to vector<1x8x8xbf16>
      tpu.vector_store %arg13[%c0_73, %c0_74, %c0_75], %105 {strides = array<i32>} : memref<4x8x8xbf16, #tpu.memory_space<vmem>>, vector<1x8x8xbf16>,
      %106 = vector.extract_strided_slice %101 {offsets = [0, 8], sizes = [8, 8], strides = [1, 1]} : vector<8x32xbf16> to vector<8x8xbf16>
      %c1_76 = arith.constant 1 : index
      %c0_77 = arith.constant 0 : index
      %c0_78 = arith.constant 0 : index
      %107 = vector.load %arg13[%c1_76, %c0_77, %c0_78] : memref<4x8x8xbf16, #tpu.memory_space<vmem>>, vector<1x8x8xbf16>
      %108 = vector.shape_cast %107 : vector<1x8x8xbf16> to vector<8x8xbf16>
      %109 = vector.shape_cast %106 : vector<8x8xbf16> to vector<1x8x8xbf16>
      tpu.vector_store %arg13[%c1_76, %c0_77, %c0_78], %109 {strides = array<i32>} : memref<4x8x8xbf16, #tpu.memory_space<vmem>>, vector<1x8x8xbf16>,
      %110 = vector.extract_strided_slice %101 {offsets = [0, 16], sizes = [8, 8], strides = [1, 1]} : vector<8x32xbf16> to vector<8x8xbf16>
      %c2_79 = arith.constant 2 : index
      %c0_80 = arith.constant 0 : index
      %c0_81 = arith.constant 0 : index
      %111 = vector.load %arg13[%c2_79, %c0_80, %c0_81] : memref<4x8x8xbf16, #tpu.memory_space<vmem>>, vector<1x8x8xbf16>
      %112 = vector.shape_cast %111 : vector<1x8x8xbf16> to vector<8x8xbf16>
      %113 = vector.shape_cast %110 : vector<8x8xbf16> to vector<1x8x8xbf16>
      tpu.vector_store %arg13[%c2_79, %c0_80, %c0_81], %113 {strides = array<i32>} : memref<4x8x8xbf16, #tpu.memory_space<vmem>>, vector<1x8x8xbf16>,
      %114 = vector.extract_strided_slice %101 {offsets = [0, 24], sizes = [8, 8], strides = [1, 1]} : vector<8x32xbf16> to vector<8x8xbf16>
      %c3_82 = arith.constant 3 : index
      %c0_83 = arith.constant 0 : index
      %c0_84 = arith.constant 0 : index
      %115 = vector.load %arg13[%c3_82, %c0_83, %c0_84] : memref<4x8x8xbf16, #tpu.memory_space<vmem>>, vector<1x8x8xbf16>
      %116 = vector.shape_cast %115 : vector<1x8x8xbf16> to vector<8x8xbf16>
      %117 = vector.shape_cast %114 : vector<8x8xbf16> to vector<1x8x8xbf16>
      tpu.vector_store %arg13[%c3_82, %c0_83, %c0_84], %117 {strides = array<i32>} : memref<4x8x8xbf16, #tpu.memory_space<vmem>>, vector<1x8x8xbf16>,
    } else {
    }
    %c0 = arith.constant 0 : index
    %c0_1 = arith.constant 0 : index
    %c0_2 = arith.constant 0 : index
    %3 = vector.load %arg2[%c0, %c0_1, %c0_2] : memref<1x8x32xbf16, #tpu.memory_space<vmem>>, vector<1x8x32xbf16>
    %4 = vector.shape_cast %3 : vector<1x8x32xbf16> to vector<8x32xbf16>
    %c0_3 = arith.constant 0 : index
    %c0_4 = arith.constant 0 : index
    %5 = vector.load %arg4[%c0_3, %c0_4] : memref<32x32xbf16, #tpu.memory_space<vmem>>, vector<32x32xbf16>
    %cst = arith.constant dense<0.000000e+00> : vector<8x32xf32>
    %6 = tpu.matmul %4, %5, %cst {dimension_numbers = #tpu.dot_dimension_numbers<[1], [0], [0], [1], [0, 0, 1, 1], [], []>} : vector<8x32xbf16>, vector<32x32xbf16>, vector<8x32xf32> -> vector<8x32xf32>
    %c0_5 = arith.constant 0 : index
    %c0_6 = arith.constant 0 : index
    %7 = vector.load %arg5[%c0_5, %c0_6] : memref<1x32xf32, #tpu.memory_space<vmem>>, vector<1x32xf32>
    %8 = vector.broadcast %7 : vector<1x32xf32> to vector<8x32xf32>
    %9 = arith.addf %6, %8 : vector<8x32xf32>
    %10 = arith.truncf %9 : vector<8x32xf32> to vector<8x32xbf16>
    %11 = vector.extract_strided_slice %10 {offsets = [0, 0], sizes = [8, 8], strides = [1, 1]} : vector<8x32xbf16> to vector<8x8xbf16>
    %c0_7 = arith.constant 0 : index
    %c0_8 = arith.constant 0 : index
    %c0_9 = arith.constant 0 : index
    %12 = vector.load %arg14[%c0_7, %c0_8, %c0_9] : memref<4x8x8xbf16, #tpu.memory_space<vmem>>, vector<1x8x8xbf16>
    %13 = vector.shape_cast %12 : vector<1x8x8xbf16> to vector<8x8xbf16>
    %14 = vector.shape_cast %11 : vector<8x8xbf16> to vector<1x8x8xbf16>
    tpu.vector_store %arg14[%c0_7, %c0_8, %c0_9], %14 {strides = array<i32>} : memref<4x8x8xbf16, #tpu.memory_space<vmem>>, vector<1x8x8xbf16>,
    %15 = vector.extract_strided_slice %10 {offsets = [0, 8], sizes = [8, 8], strides = [1, 1]} : vector<8x32xbf16> to vector<8x8xbf16>
    %c1 = arith.constant 1 : index
    %c0_10 = arith.constant 0 : index
    %c0_11 = arith.constant 0 : index
    %16 = vector.load %arg14[%c1, %c0_10, %c0_11] : memref<4x8x8xbf16, #tpu.memory_space<vmem>>, vector<1x8x8xbf16>
    %17 = vector.shape_cast %16 : vector<1x8x8xbf16> to vector<8x8xbf16>
    %18 = vector.shape_cast %15 : vector<8x8xbf16> to vector<1x8x8xbf16>
    tpu.vector_store %arg14[%c1, %c0_10, %c0_11], %18 {strides = array<i32>} : memref<4x8x8xbf16, #tpu.memory_space<vmem>>, vector<1x8x8xbf16>,
    %19 = vector.extract_strided_slice %10 {offsets = [0, 16], sizes = [8, 8], strides = [1, 1]} : vector<8x32xbf16> to vector<8x8xbf16>
    %c2 = arith.constant 2 : index
    %c0_12 = arith.constant 0 : index
    %c0_13 = arith.constant 0 : index
    %20 = vector.load %arg14[%c2, %c0_12, %c0_13] : memref<4x8x8xbf16, #tpu.memory_space<vmem>>, vector<1x8x8xbf16>
    %21 = vector.shape_cast %20 : vector<1x8x8xbf16> to vector<8x8xbf16>
    %22 = vector.shape_cast %19 : vector<8x8xbf16> to vector<1x8x8xbf16>
    tpu.vector_store %arg14[%c2, %c0_12, %c0_13], %22 {strides = array<i32>} : memref<4x8x8xbf16, #tpu.memory_space<vmem>>, vector<1x8x8xbf16>,
    %23 = vector.extract_strided_slice %10 {offsets = [0, 24], sizes = [8, 8], strides = [1, 1]} : vector<8x32xbf16> to vector<8x8xbf16>
    %c3 = arith.constant 3 : index
    %c0_14 = arith.constant 0 : index
    %c0_15 = arith.constant 0 : index
    %24 = vector.load %arg14[%c3, %c0_14, %c0_15] : memref<4x8x8xbf16, #tpu.memory_space<vmem>>, vector<1x8x8xbf16>
    %25 = vector.shape_cast %24 : vector<1x8x8xbf16> to vector<8x8xbf16>
    %26 = vector.shape_cast %23 : vector<8x8xbf16> to vector<1x8x8xbf16>
    tpu.vector_store %arg14[%c3, %c0_14, %c0_15], %26 {strides = array<i32>} : memref<4x8x8xbf16, #tpu.memory_space<vmem>>, vector<1x8x8xbf16>,
    %c0_16 = arith.constant 0 : index
    %c0_17 = arith.constant 0 : index
    %c0_18 = arith.constant 0 : index
    %27 = vector.load %arg14[%c0_16, %c0_17, %c0_18] : memref<4x8x8xbf16, #tpu.memory_space<vmem>>, vector<4x8x8xbf16>
    %c0_19 = arith.constant 0 : index
    %c0_20 = arith.constant 0 : index
    %c0_21 = arith.constant 0 : index
    %28 = vector.load %arg12[%c0_19, %c0_20, %c0_21] : memref<4x8x8xbf16, #tpu.memory_space<vmem>>, vector<4x8x8xbf16>
    %cst_22 = arith.constant dense<0.000000e+00> : vector<4x8x8xf32>
    %29 = tpu.matmul %27, %28, %cst_22 {dimension_numbers = #tpu.dot_dimension_numbers<[2], [2], [1], [1], [0, 0, 0, 1, 1, 1], [0], [0]>} : vector<4x8x8xbf16>, vector<4x8x8xbf16>, vector<4x8x8xf32> -> vector<4x8x8xf32>
    %cst_23 = arith.constant dense<0xFF800000> : vector<4x8xf32>
    %30 = vector.multi_reduction <maximumf>, %29, %cst_23 [2] : vector<4x8x8xf32> to vector<4x8xf32>
    %31 = vector.shape_cast %30 : vector<4x8xf32> to vector<4x8x1xf32>
    %32 = vector.broadcast %31 : vector<4x8x1xf32> to vector<4x8x8xf32>
    %33 = arith.subf %29, %32 : vector<4x8x8xf32>
    %34 = math.exp %33 : vector<4x8x8xf32>
    %cst_24 = arith.constant dense<0.000000e+00> : vector<4x8xf32>
    %35 = vector.multi_reduction <add>, %34, %cst_24 [2] : vector<4x8x8xf32> to vector<4x8xf32>
    %36 = vector.shape_cast %35 : vector<4x8xf32> to vector<4x8x1xf32>
    %cst_25 = arith.constant 1.000000e+00 : f32
    %37 = vector.broadcast %cst_25 : f32 to vector<4x8x1xf32>
    %38 = arith.divf %37, %36 : vector<4x8x1xf32>
    %39 = vector.broadcast %38 : vector<4x8x1xf32> to vector<4x8x8xf32>
    %40 = arith.mulf %34, %39 : vector<4x8x8xf32>
    %41 = arith.truncf %40 : vector<4x8x8xf32> to vector<4x8x8xbf16>
    %c0_26 = arith.constant 0 : index
    %c0_27 = arith.constant 0 : index
    %c0_28 = arith.constant 0 : index
    %c0_29 = arith.constant 0 : index
    %42 = vector.load %arg11[%c0_26, %c0_27, %c0_28, %c0_29] : memref<1x4x8x8xbf16, #tpu.memory_space<vmem>>, vector<1x4x8x8xbf16>
    %43 = vector.shape_cast %42 : vector<1x4x8x8xbf16> to vector<4x8x8xbf16>
    %44 = vector.shape_cast %41 : vector<4x8x8xbf16> to vector<1x4x8x8xbf16>
    tpu.vector_store %arg11[%c0_26, %c0_27, %c0_28, %c0_29], %44 {strides = array<i32>} : memref<1x4x8x8xbf16, #tpu.memory_space<vmem>>, vector<1x4x8x8xbf16>,
    %c0_30 = arith.constant 0 : index
    %c0_31 = arith.constant 0 : index
    %c0_32 = arith.constant 0 : index
    %45 = vector.load %arg13[%c0_30, %c0_31, %c0_32] : memref<4x8x8xbf16, #tpu.memory_space<vmem>>, vector<4x8x8xbf16>
    %cst_33 = arith.constant dense<0.000000e+00> : vector<4x8x8xf32>
    %46 = tpu.matmul %41, %45, %cst_33 {dimension_numbers = #tpu.dot_dimension_numbers<[2], [1], [1], [2], [0, 0, 0, 1, 1, 2], [0], [0]>} : vector<4x8x8xbf16>, vector<4x8x8xbf16>, vector<4x8x8xf32> -> vector<4x8x8xf32>
    %47 = vector.extract_strided_slice %46 {offsets = [0, 0, 0], sizes = [1, 8, 8], strides = [1, 1, 1]} : vector<4x8x8xf32> to vector<1x8x8xf32>
    %48 = vector.shape_cast %47 : vector<1x8x8xf32> to vector<8x8xf32>
    %49 = arith.truncf %48 : vector<8x8xf32> to vector<8x8xbf16>
    %c0_34 = arith.constant 0 : index
    %c0_35 = arith.constant 0 : index
    %50 = vector.load %arg15[%c0_34, %c0_35] : memref<8x32xbf16, #tpu.memory_space<vmem>>, vector<8x8xbf16>
    tpu.vector_store %arg15[%c0_34, %c0_35], %49 {strides = array<i32>} : memref<8x32xbf16, #tpu.memory_space<vmem>>, vector<8x8xbf16>,
    %51 = vector.extract_strided_slice %46 {offsets = [1, 0, 0], sizes = [1, 8, 8], strides = [1, 1, 1]} : vector<4x8x8xf32> to vector<1x8x8xf32>
    %52 = vector.shape_cast %51 : vector<1x8x8xf32> to vector<8x8xf32>
    %53 = arith.truncf %52 : vector<8x8xf32> to vector<8x8xbf16>
    %c0_36 = arith.constant 0 : index
    %c8 = arith.constant 8 : index
    %54 = vector.load %arg15[%c0_36, %c8] : memref<8x32xbf16, #tpu.memory_space<vmem>>, vector<8x8xbf16>
    tpu.vector_store %arg15[%c0_36, %c8], %53 {strides = array<i32>} : memref<8x32xbf16, #tpu.memory_space<vmem>>, vector<8x8xbf16>,
    %55 = vector.extract_strided_slice %46 {offsets = [2, 0, 0], sizes = [1, 8, 8], strides = [1, 1, 1]} : vector<4x8x8xf32> to vector<1x8x8xf32>
    %56 = vector.shape_cast %55 : vector<1x8x8xf32> to vector<8x8xf32>
    %57 = arith.truncf %56 : vector<8x8xf32> to vector<8x8xbf16>
    %c0_37 = arith.constant 0 : index
    %c16 = arith.constant 16 : index
    %58 = vector.load %arg15[%c0_37, %c16] : memref<8x32xbf16, #tpu.memory_space<vmem>>, vector<8x8xbf16>
    tpu.vector_store %arg15[%c0_37, %c16], %57 {strides = array<i32>} : memref<8x32xbf16, #tpu.memory_space<vmem>>, vector<8x8xbf16>,
    %59 = vector.extract_strided_slice %46 {offsets = [3, 0, 0], sizes = [1, 8, 8], strides = [1, 1, 1]} : vector<4x8x8xf32> to vector<1x8x8xf32>
    %60 = vector.shape_cast %59 : vector<1x8x8xf32> to vector<8x8xf32>
    %61 = arith.truncf %60 : vector<8x8xf32> to vector<8x8xbf16>
    %c0_38 = arith.constant 0 : index
    %c24 = arith.constant 24 : index
    %62 = vector.load %arg15[%c0_38, %c24] : memref<8x32xbf16, #tpu.memory_space<vmem>>, vector<8x8xbf16>
    tpu.vector_store %arg15[%c0_38, %c24], %61 {strides = array<i32>} : memref<8x32xbf16, #tpu.memory_space<vmem>>, vector<8x8xbf16>,
    %c0_39 = arith.constant 0 : index
    %c0_40 = arith.constant 0 : index
    %63 = vector.load %arg15[%c0_39, %c0_40] : memref<8x32xbf16, #tpu.memory_space<vmem>>, vector<8x32xbf16>
    %c0_41 = arith.constant 0 : index
    %c0_42 = arith.constant 0 : index
    %64 = vector.load %arg8[%c0_41, %c0_42] : memref<32x32xbf16, #tpu.memory_space<vmem>>, vector<32x32xbf16>
    %cst_43 = arith.constant dense<0.000000e+00> : vector<8x32xf32>
    %65 = tpu.matmul %63, %64, %cst_43 {dimension_numbers = #tpu.dot_dimension_numbers<[1], [0], [0], [1], [0, 0, 1, 1], [], []>} : vector<8x32xbf16>, vector<32x32xbf16>, vector<8x32xf32> -> vector<8x32xf32>
    %c0_44 = arith.constant 0 : index
    %c0_45 = arith.constant 0 : index
    %66 = vector.load %arg9[%c0_44, %c0_45] : memref<1x32xf32, #tpu.memory_space<vmem>>, vector<1x32xf32>
    %67 = vector.broadcast %66 : vector<1x32xf32> to vector<8x32xf32>
    %68 = arith.addf %65, %67 : vector<8x32xf32>
    %c0_46 = arith.constant 0 : index
    %c0_47 = arith.constant 0 : index
    %c0_48 = arith.constant 0 : index
    %69 = vector.load %arg10[%c0_46, %c0_47, %c0_48] : memref<1x8x32xf32, #tpu.memory_space<vmem>>, vector<1x8x32xf32>
    %70 = vector.shape_cast %69 : vector<1x8x32xf32> to vector<8x32xf32>
    %71 = vector.shape_cast %68 : vector<8x32xf32> to vector<1x8x32xf32>
    tpu.vector_store %arg10[%c0_46, %c0_47, %c0_48], %71 {strides = array<i32>} : memref<1x8x32xf32, #tpu.memory_space<vmem>>, vector<1x8x32xf32>,
    return
  }
  func.func @transform_0(%arg0: i32, %arg1: i32) -> (i32, i32, i32) {
    %c0_i32 = arith.constant 0 : i32
    %c0_i32_0 = arith.constant 0 : i32
    return %arg0, %arg1, %c0_i32 : i32, i32, i32
  }
  func.func @transform_1(%arg0: i32, %arg1: i32) -> (i32, i32, i32) {
    %c0_i32 = arith.constant 0 : i32
    %c0_i32_0 = arith.constant 0 : i32
    %c0_i32_1 = arith.constant 0 : i32
    return %arg0, %c0_i32, %c0_i32_0 : i32, i32, i32
  }
  func.func @transform_2(%arg0: i32, %arg1: i32) -> (i32, i32) {
    %c0_i32 = arith.constant 0 : i32
    %c0_i32_0 = arith.constant 0 : i32
    %c0_i32_1 = arith.constant 0 : i32
    return %c0_i32, %c0_i32_0 : i32, i32
  }
  func.func @transform_3(%arg0: i32, %arg1: i32) -> (i32, i32) {
    %c0_i32 = arith.constant 0 : i32
    %c0_i32_0 = arith.constant 0 : i32
    %c0_i32_1 = arith.constant 0 : i32
    return %c0_i32, %c0_i32_0 : i32, i32
  }
  func.func @transform_4(%arg0: i32, %arg1: i32) -> (i32, i32) {
    %c0_i32 = arith.constant 0 : i32
    %c0_i32_0 = arith.constant 0 : i32
    %c0_i32_1 = arith.constant 0 : i32
    return %c0_i32, %c0_i32_0 : i32, i32
  }
  func.func @transform_5(%arg0: i32, %arg1: i32) -> (i32, i32) {
    %c0_i32 = arith.constant 0 : i32
    %c0_i32_0 = arith.constant 0 : i32
    %c0_i32_1 = arith.constant 0 : i32
    return %c0_i32, %c0_i32_0 : i32, i32
  }
  func.func @transform_6(%arg0: i32, %arg1: i32) -> (i32, i32) {
    %c0_i32 = arith.constant 0 : i32
    %c0_i32_0 = arith.constant 0 : i32
    %c0_i32_1 = arith.constant 0 : i32
    return %c0_i32, %c0_i32_0 : i32, i32
  }
  func.func @transform_7(%arg0: i32, %arg1: i32) -> (i32, i32) {
    %c0_i32 = arith.constant 0 : i32
    %c0_i32_0 = arith.constant 0 : i32
    %c0_i32_1 = arith.constant 0 : i32
    return %c0_i32, %c0_i32_0 : i32, i32
  }
  func.func @transform_8(%arg0: i32, %arg1: i32) -> (i32, i32, i32) {
    %c0_i32 = arith.constant 0 : i32
    %c0_i32_0 = arith.constant 0 : i32
    return %arg0, %arg1, %c0_i32 : i32, i32, i32
  }
  func.func @transform_9(%arg0: i32, %arg1: i32) -> (i32, i32, i32, i32) {
    %c0_i32 = arith.constant 0 : i32
    %c0_i32_0 = arith.constant 0 : i32
    %c0_i32_1 = arith.constant 0 : i32
    return %arg0, %c0_i32, %arg1, %c0_i32_0 : i32, i32, i32, i32
  }
}

</mosaic_0001>

<bundles_post_ra>
// kernel: tpu_custom_call.1
= control target key start
LH: loop header
LB: loop body
LE: loop exit
PB: predicated region body
PF: predicated region fallthrough
CT: control target
= control target key end

     0   :  { %s2478_s0 = inlined_call_operand.hbm [shape: bf16[2,8,32], index: 0, kind: input, shape index: {}]   ;;  %s2479_s1 = inlined_call_operand.hbm [shape: bf16[2,8,32], index: 1, kind: input, shape index: {}]   ;;  %s2480_s2 = inlined_call_operand.hbm [shape: bf16[32,32], index: 2, kind: input, shape index: {}]   ;;  %s2481_s3 = inlined_call_operand.vmem [shape: f32[1,32], index: 3, kind: input, shape index: {}]   ;;  %s2482_s4 = inlined_call_operand.hbm [shape: bf16[32,64], index: 4, kind: input, shape index: {}]   ;;  %s2483_s5 = inlined_call_operand.vmem [shape: f32[1,64], index: 5, kind: input, shape index: {}]   ;;  %s2484_s6 = inlined_call_operand.hbm [shape: bf16[32,32], index: 6, kind: input, shape index: {}]   ;;  %s2485_s7 = inlined_call_operand.vmem [shape: f32[1,32], index: 7, kind: input, shape index: {}]   ;;  %s2486_s8 = inlined_call_operand.hbm [shape: f32[2,8,32], index: 8, kind: output, shape index: {0}]   ;;  %s2487_s9 = inlined_call_operand.hbm [shape: bf16[2,4,8,8], index: 9, kind: output, shape index: {1}]  }
   0x1   :  { %2493 = sst [smem:[#allocation27_spill]] %s2478_s0 }
   0x2   :  { %2494 = sst [smem:[#allocation28_spill]] %s2480_s2 }
   0x3   :  { %2495 = sst [smem:[#allocation29_spill]] %s2482_s4 }
   0x4   :  { %2496 = sst [smem:[#allocation30_spill]] %s2484_s6 }
   0x5   :  { %15 = vsyncpa [#allocation7], 0 }
   0x6   :  { %17 = vsyncpa [#allocation7 + $0x1], 0 }
   0x7   :  { %18 = vsyncpa [#allocation10], 0 }
   0x8   :  { %20 = vsyncpa [#allocation10 + $0x1], 0 }
   0x9   :  { %21 = vsyncpa [#allocation13], 0 }
   0xa   :  { %22 = vsyncpa [#allocation8], 0 }
   0xb   :  { %24 = vsyncpa [#allocation8 + $0x1], 0 }
   0xc   :  { %25 = vsyncpa [#allocation17], 0 }
   0xd   :  { %27 = vsyncpa [#allocation17 + $0x1], 0  ;;  %s2106_s30 = smov 0   ;;  %s2108_s10 = smov 0  }
   0xe   :  { %s2110_s11 = smov 0   ;;  %s2112_s12 = smov 0  }
   0xf   :  { %s2114_s13 = smov 0   ;;  %s2116_s14 = smov 0  }
  0x10 LB: > { %2497 = sst [smem:[#allocation24_spill]] %s2014_s30  ;;  %s2137_s15 = sadd.s32 4294967295, %s2034_s14   ;;  %s2034_s14 = sphi %s2116_s14, %s33_s14   ;;  %s2030_s13 = sphi %s2114_s13, %s2525_s13   ;;  %s2026_s12 = sphi %s2112_s12, %s2524_s12   ;;  %s2022_s11 = sphi %s2110_s11, %s2523_s11   ;;  %s2018_s10 = sphi %s2108_s10, %s2522_s10   ;;  %s2014_s30 = sphi %s2106_s30, %s2521_s30  }
  0x11   : > { %s1468_s16 = sadd.s32 4294967294, %s2034_s14   ;;  %p67_p0 = scmp.ne.s32.totalorder %s2018_s10, %s2014_s30 }
  0x12   : > { %p2488_p1 = scmp.eq.s32.totalorder %s2137_s15, 0  ;;  %p251_p3 = scmp.eq.s32.totalorder %s1468_s16, 1 }
  0x13   : > { %p1469_p5 = scmp.ge.s32.totalorder %s2034_s14, 1  ;;  %p286_p7 = scmp.lt.s32.totalorder %s2034_s14, 3 }
  0x14   : > { %p2146_p4 = por %p2488_p1, %p67_p0  ;;  %p2151_p6 = por %p251_p3, %p67_p0 }
  0x15   : > { %p2156_p8 = pnand %p1469_p5, %p286_p7  ;;  %s2036_s20 = smov [#allocation11]  }
  0x16   : > { %s2498_s17 = scalar_select %p2146_p4, 1, 0 }
  0x17   : > { %s2499_s18 = scalar_select %p2151_p6, 1, 0 }
  0x18   : > { %s298_s21 = sshll.u32 %s2036_s20, 4  ;;  %p1658_p9 = pneg %p2156_p8  ;;  %s299_s21 = int_to_ptr.vmem [resolvable:$true] %s298_s21 }
  0x19   : > { %2500 = sst [smem:[#allocation25_spill]] %s2499_s18  ;;  %s2037_s23 = smov [#allocation12]  }
  0x1a   : > { %p2165_p11 = pnand %p1658_p9, %p2488_p1  ;;  %s314_s24 = sshll.u32 %s2037_s23, 4  ;;  %s315_s24 = int_to_ptr.vmem [resolvable:$true] %s314_s24 }
  0x1b   : > { %s2038_s25 = smov [#allocation14]   ;;  %s1789_s27 = scalar_lea.vmem %s299_s21, 256 }
  0x1c   : > { %s330_s26 = sshll.u32 %s2038_s25, 4  ;;  %p1780_p12 = pneg %p2165_p11  ;;  %s331_s26 = int_to_ptr.vmem [resolvable:$true] %s330_s26 }
  0x1d   : > { %p1790_p13 = scmp.ne.s32.totalorder %s299_s21, %s1789_s27  ;;  %p1797_p5 = scmp.lt.s32.totalorder %s299_s21, %s299_s21 }
  0x1e   : > { %p1798_p7 = scmp.lt.s32.totalorder %s1789_s27, %s1789_s27 }
  0x1f   : > { %p1792_p0 = pnand %p1790_p13, %p1780_p12 }
  0x20   : > { %p1799_p9 = por %p1798_p7, %p1797_p5 }
  0x21   : > { %p1793_p3 = pneg %p1792_p0 }
  0x23   : > { %p1800_p10 = pnand %p1799_p9, %p1793_p3 }
  0x25   : > { %1803 = shalt.err (!%p1800_p10)
}
  0x26   : > { %s2039_s28 = smov 64   ;;  %s2040_s29 = smov 4  }
  0x27   : > { %s2503_s2 = sld [smem:[#allocation28_spill]]  ;;  %s1815_s23 = scalar_lea.vmem %s315_s24, 256 }
  0x28   : > { %p1816_p1 = scmp.ne.s32.totalorder %s315_s24, %s1815_s23  ;;  %p1823_p2 = scmp.lt.s32.totalorder %s315_s24, %s315_s24 }
  0x29   : > { %p1824_p6 = scmp.lt.s32.totalorder %s1815_s23, %s1815_s23 }
  0x2a   : > { %p1818_p13 = pnand %p1816_p1, %p1780_p12 }
  0x2b   : > { %p1825_p5 = por %p1824_p6, %p1823_p2 }
  0x2c   : > { %p1819_p0 = pneg %p1818_p13 }
  0x2d   : > { %1661 = dma.hbm_to_vmem [thread:$0]  (!%p2165_p11), %s2503_s2, 256, %s299_s21, [#allocation10], %s2039_s28, %s2039_s28, %s2040_s29  }
  0x2e   : > { %p1826_p3 = pnand %p1825_p5, %p1819_p0 }
  0x30   : > { %1829 = shalt.err (!%p1826_p3)
}
  0x31   : > { %s2504_s4 = sld [smem:[#allocation29_spill]]  ;;  %s1841_s21 = scalar_lea.vmem %s331_s26, 256 }
  0x32   : > { %p1842_p10 = scmp.ne.s32.totalorder %s331_s26, %s1841_s21  ;;  %p1849_p9 = scmp.lt.s32.totalorder %s331_s26, %s331_s26 }
  0x33   : > { %p1850_p13 = scmp.lt.s32.totalorder %s1841_s21, %s1841_s21 }
  0x34   : > { %p1844_p7 = pnand %p1842_p10, %p1780_p12 }
  0x35   : > { %p1851_p4 = por %p1850_p13, %p1849_p9 }
  0x36   : > { %p1845_p1 = pneg %p1844_p7 }
  0x37   : > { %1664 = dma.hbm_to_vmem [thread:$0]  (!%p2165_p11), %s2504_s4, 256, %s315_s24, [#allocation13], %s2039_s28, %s2039_s28, %s2040_s29  }
  0x38   : > { %p1852_p2 = pnand %p1851_p4, %p1845_p1 }
  0x3a   : > { %1855 = shalt.err (!%p1852_p2)
}
  0x3b   : > { %s2505_s6 = sld [smem:[#allocation30_spill]]  ;;  %s54_s24 = sadd.s32 1, %s2022_s11 }
  0x3c   : > { %s45_s23 = sadd.s32 1, %s2030_s13  ;;  %p61_p4 = scmp.ne.s32.totalorder %s2022_s11, %s2018_s10 }
  0x3d   : > { %p47_p6 = scmp.ge.s32.totalorder %s45_s23, 2  ;;  %p62_p12 = scmp.eq.s32.totalorder %s2034_s14, 0 }
  0x3e   : > { %p2506_p0 = scmp.eq.s32.totalorder %s2137_s15, 1  ;;  %p1685_p3 = scmp.lt.s32.totalorder %s2034_s14, 2 }
  0x3f   : > { %s2527_s23 = smov (%p47_p6, %s45_s23), 0  ;;  %p63_p10 = por %p62_p12, %p61_p4 }
  0x40   : > { %p2202_p5 = por %p2506_p0, %p61_p4  ;;  %2508 = sst [smem:[#allocation26_spill]] %s2527_s23 }
  0x41   : > { %1667 = dma.hbm_to_vmem [thread:$0]  (!%p2165_p11), %s2505_s6, 256, %s331_s26, [#allocation13], %s2039_s28, %s2039_s28, %s2040_s29  }
  0x42   : > { %s347_s25 = sand.u32 1, %s2022_s11   ;;  %s49_s27 = ssub.s32 %s2030_s13, %s2527_s23 }
  0x43   : > { %p52_p11 = scmp.eq.s32.totalorder %s49_s27, 0  ;;  %s1474_s26 = sshll.u32 %s347_s25, 2 }
  0x44   : > { %s1475_s28 = sshll.u32 %s2030_s13, 6  ;;  %s2509_s0 = sld [smem:[#allocation27_spill]] }
  0x45   : > { %s2214_s29 = scalar_select %p52_p11, %s2022_s11, %s54_s24  }
  0x46   : > { %s351_s2 = scalar_lea.vmem [#allocation6], %s1474_s26  ;;  %p2221_p7 = pnand %p1685_p3, %p63_p10 }
  0x47   : > { %s359_s4 = sshll.u32 %s351_s2, 4  ;;  %s2228_s27 = scalar_lea.hbm %s2479_s1, %s1475_s28  ;;  %s360_s4 = int_to_ptr.vmem [resolvable:$true] %s359_s4 }
  0x48   : > { %s366_s24 = sand.u32 1, %s2034_s14   ;;  %s348_s23 = scalar_lea.sflag [#allocation7], %s347_s25 }
  0x49   : > { %p1858_p1 = pneg %p2221_p7  ;;  %s1869_s21 = scalar_lea.vmem %s360_s4, 64 }
  0x4a   : > { %s357_s20 = scalar_lea.hbm %s2509_s0, %s1475_s28  ;;  %p1870_p9 = scmp.ne.s32.totalorder %s360_s4, %s1869_s21 }
  0x4b   : > { %s2041_s2 = smov [#allocation6]  }
  0x4c   : > { %p1872_p13 = pnand %p1870_p9, %p1858_p1  ;;  %s1874_s16 = sshll.u32 %s2041_s2, 4  ;;  %s1875_s16 = int_to_ptr.vmem [resolvable:$false] %s1874_s16 }
  0x4d   : > { %s1876_s0 = scalar_lea.vmem %s1875_s16, 128  ;;  %p1877_p4 = scmp.lt.s32.totalorder %s360_s4, %s1875_s16 }
  0x4e   : > { %p1873_p2 = pneg %p1872_p13  ;;  %p1878_p6 = scmp.lt.s32.totalorder %s1876_s0, %s1869_s21 }
  0x50   : > { %p1879_p12 = por %p1878_p6, %p1877_p4 }
  0x52   : > { %p1880_p0 = pnand %p1879_p12, %p1873_p2 }
  0x54   : > { %1883 = shalt.err (!%p1880_p0)
}
  0x55   : > { %1671 = dma.hbm_to_vmem [thread:$0]  (!%p2221_p7), %s357_s20, 64, %s360_s4, %s348_s23  }
  0x56   : > { %s370_s30 = scalar_lea.vmem [#allocation9], %s1474_s26  ;;  %s367_s25 = scalar_lea.sflag [#allocation10], %s366_s24 }
  0x57   : > { %s377_s18 = sshll.u32 %s370_s30, 4  ;;  %s2042_s2 = smov [#allocation9]   ;;  %s378_s18 = int_to_ptr.vmem [resolvable:$true] %s377_s18 }
  0x58   : > { %s1897_s28 = scalar_lea.vmem %s378_s18, 64  ;;  %s1902_s16 = sshll.u32 %s2042_s2, 4  ;;  %s1903_s16 = int_to_ptr.vmem [resolvable:$false] %s1902_s16 }
  0x59   : > { %p1898_p3 = scmp.ne.s32.totalorder %s378_s18, %s1897_s28  ;;  %s1904_s0 = scalar_lea.vmem %s1903_s16, 128 }
  0x5a   : > { %p1905_p9 = scmp.lt.s32.totalorder %s378_s18, %s1903_s16  ;;  %p1906_p13 = scmp.lt.s32.totalorder %s1904_s0, %s1897_s28 }
  0x5b   : > { %p1900_p10 = pnand %p1898_p3, %p1858_p1 }
  0x5c   : > { %p1907_p2 = por %p1906_p13, %p1905_p9 }
  0x5d   : > { %p1901_p11 = pneg %p1900_p10 }
  0x5f   : > { %p1908_p4 = pnand %p1907_p2, %p1901_p11 }
  0x61   : > { %1911 = shalt.err (!%p1908_p4)
}
  0x62   : > { %1674 = dma.hbm_to_vmem [thread:$0]  (!%p2221_p7), %s2228_s27, 64, %s378_s18, %s367_s25  }
  0x63   : > { %386 = sbr.rel (%p2156_p8) target bundleno = 1504 (0x5e0), region = 52  ;;  %s2247_s4 = sand.u32 (!%p2156_p8), 1, %s2018_s10  }
  0x64   : > { %s1479_s23 = sshll.u32 (!%p2156_p8), %s2247_s4, 2  ;;  %s389_s26 = scalar_lea.sflag (!%p2156_p8), [#allocation7], %s2247_s4 }
  0x65   : > { %s2251_s20 = scalar_lea.vmem (!%p2156_p8), [#allocation6], %s1479_s23  ;;  %p2511_p1 = scmp.ne.s32.totalorder (!%p2156_p8), %s2498_s17, 0 }
  0x68   : > { %1989 = dma.done.wait (%p2511_p1), %s389_s26, 64  }
  0x69   : > { %1991 = vsyncadd (%p2511_p1), %s389_s26, 4294967232  ;;  %s397_s6 = sand.u32 1, %s2137_s15   ;;  %s401_s27 = scalar_lea.vmem [#allocation9], %s1479_s23 }
  0x6a   : > { %s398_s19 = scalar_lea.sflag [#allocation10], %s397_s6 }
  0x6b   : > { %1993 = dma.done.wait (%p2511_p1), %s398_s19, 64  }
  0x6c   : > { %1995 = vsyncadd (%p2511_p1), %s398_s19, 4294967232  ;;  %p2512_p8 = scmp.eq.s32.totalorder %s2137_s15, 0 }
  0x6e   : > { %1997 = dma.done.wait (%p2512_p8), [#allocation10], 256   ;;  %p2513_p7 = pmov %p2512_p8 }
  0x70   : > { %1999 = vsyncadd (%p2513_p7), [#allocation10], 4294967040  ;;  %p2514_p6 = pmov %p2513_p7 }
  0x72   : > { %2001 = dma.done.wait (%p2514_p6), [#allocation13], 512   ;;  %p2515_p12 = pmov %p2514_p6 }
  0x73   : > { %v2043_v0 = vmov 0.0   ;;  %vm2044_vm0 = vmmov 0   ;;  %v1754_v1 = vld [vmem:[#allocation12 + $0x8] sm:$0xff]   ;;  %v1755_v2 = vld [vmem:[#allocation12] sm:$0xff]   ;;  %vm487_vm1 = vcmask 261120   ;;  %v1756_v4 = vld [vmem:[#allocation11 + $0x8] sm:$0xff]  }
  0x74   : > { %2003 = vsyncadd (%p2515_p12), [#allocation13], 4294966784  ;;  %1558 = vmatprep.subr.bf16.mxu0 %v2043_v0  ;;  %1562 = vmatprep.mubr.msk.bf16.mxu0 %vm2044_vm0, %v2043_v0  ;;  %v2277_v3 = vld [vmem:[%s401_s27] sm:$0xf]  ;;  %v1757_v5 = vld [vmem:[#allocation11] sm:$0xff]   ;;  %s2045_s15 = smov 96  }
  0x75   : > { %1566 = vmatprep.subr.bf16.mxu1 %v2043_v0  ;;  %1570 = vmatprep.mubr.msk.bf16.mxu1 %vm2044_vm0, %v2043_v0  ;;  %v641_v6 = vld [vmem:[%s2251_s20] sm:$0xf]  ;;  %v2294_v8 = vld [vmem:[%s2483_s5] ss:$0 sm:$0xff]  ;;  %vm532_vm2 = vcmask 60416   ;;  %s2046_s21 = smov 112  }
  0x76   : > { %1559 = vmatpush3.bf16.msra.mxu0 %v1754_v1  ;;  %v1758_v7 = vld [vmem:[#allocation12] sm:$0xff]   ;;  %s2047_s30 = smov 120   ;;  %v1759_v14 = vld [vmem:[#allocation12 + $0x8] sm:$0xff]   ;;  %s2048_s28 = smov 104   ;;  %vm738_vm3 = vcmask 64512   ;;  %vm986_vm4 = vcmask 1043456  }
  0x77   : > { %1560 = vmatprep.subr.bf16.mxu0 %v2043_v0  ;;  %572 = vrot.lane.b32.xlu1 %v1758_v7, %s2045_s15  ;;  %v1496_v16 = vld [vmem:[%s2481_s3] ss:$0 sm:$0xff]  ;;  %s1485_s2 = sshll.u32 %s2247_s4, 4  ;;  %s2049_s0 = smov 8   ;;  %vm1177_vm5 = vcmask 126016   ;;  %vm1186_vm6 = vcmask 191616  }
  0x78   : > { %s2363_s16 = scalar_lea.vmem [#allocation16], %s1485_s2  ;;  %s2050_s23 = smov 16   ;;  %vm1195_vm7 = vcmask 257216  }
  0x79   : > { %s2051_s26 = smov 24   ;;  %s1529_s20 = sshll.u32 %s2026_s12, 8 }
  0x7a   : > { %1561 = vmatpush3.bf16.msra.mxu0 %v1755_v2  ;;  %s1299_s6 = sshll.u32 %s2363_s16, 4  ;;  %s1271_s17 = scalar_lea.sflag [#allocation17], %s2247_s4  ;;  %s2396_s6 = int_to_ptr.vmem [resolvable:$true] %s1299_s6 }
  0x7b   : > { %1574 = vmatprep.subr.bf16.mxu0 %v2043_v0  ;;  %s1912_s24 = scalar_lea.vmem %s2396_s6, 256 }
  0x7c   : > { %p1913_p0 = scmp.ne.s32.totalorder %s2396_s6, %s1912_s24 }
  0x7d   : > { %1563 = vmatmul.mubr.msk.bf16.vlgmr.msra.gmra.mxu0 %vm487_vm1, %v2277_v3 }
  0x7e   : > { %1575 = vmatpush3.bf16.msra.mxu0 %v1756_v4  ;;  %1578 = vmatprep.mubr.msk.bf16.mxu0 %vm2044_vm0, %v2043_v0  ;;  %p1914_p3 = pnand %p1913_p0, %p2202_p5 }
  0x7f   : > { %1576 = vmatprep.subr.bf16.mxu0 %v2043_v0 }
  0x80   : > { %p1915_p10 = pneg %p1914_p3 }
  0x82   : > { %1577 = vmatpush3.bf16.msra.mxu0 %v1757_v5 }
  0x83   : > { %1588 = vmatprep.subr.bf16.mxu0 %v2043_v0 }
  0x85   : > { %1579 = vmatmul.mubr.msk.bf16.vlgmr.msra.gmra.mxu0 %vm487_vm1, %v641_v6 }
  0x86   : > { %1590 = vmatprep.mubr.msk.bf16.mxu0 %vm2044_vm0, %v2043_v0 }
  0xe9   : > { %v573_v23 = vpop.permute.xlu1 %572 }
 0x13d   : > { %v525_v9 = vpop.f32.mrf.mxu0 }
 0x13e   : > { %v526_v10 = vadd.f32 %v2294_v8, %v525_v9 }
 0x13f   : > { %v1564_v11 = vpop.f32.mrf.mxu0 }
 0x140   : > { %v531_v12 = vpack.c.bf16 %v526_v10, %v526_v10 }
 0x141   : > { %v528_v13 = vpop.f32.mrf.mxu0 }
 0x142   : > { %533 = vst.msk [vmem:[#allocation2] sm:$0xf] %vm532_vm2, %v531_v12  ;;  %542 = vrot.lane.b32.xlu1 %v531_v12, %s2046_s21  ;;  %537 = vrot.lane.b32.xlu0 %v531_v12, %s2047_s30 }
 0x143   : > { %v1565_v15 = vpop.f32.mrf.mxu0 }
 0x145   : > { %v703_v17 = vpop.f32.mrf.mxu0 }
 0x146   : > { %v704_v18 = vadd.f32 %v1496_v16, %v703_v17  ;;  %574 = vrot.lane.b32.xlu0 %v1759_v14, %s2045_s15 }
 0x147   : > { %v1580_v19 = vpop.f32.mrf.mxu0 }
 0x148   : > { %v709_v20 = vpack.c.bf16 %v704_v18, %v704_v18 }
 0x149   : > { %v706_v21 = vpop.f32.mrf.mxu0  ;;  %v734_v31 = vld [vmem:[#allocation2] sm:$0xf] }
 0x14a   : > { %711 = vst.msk [vmem:[#allocation4] sm:$0xf] %vm532_vm2, %v709_v20  ;;  %547 = vrot.lane.b32.xlu0 %v531_v12, %s2048_s28  ;;  %715 = vrot.lane.b32.xlu1 %v709_v20, %s2047_s30  ;;  %v743_v32 = vsel %vm738_vm3, %v734_v31, 0 }
 0x14b   : > { %v1581_v22 = vpop.f32.mrf.mxu0 }
 0x14e   : > { %720 = vrot.lane.b32.xlu0 %v709_v20, %s2046_s21  ;;  %725 = vrot.lane.b32.xlu1 %v709_v20, %s2048_s28 }
 0x151   : > { %v730_v39 = vld [vmem:[#allocation4] sm:$0xf] }
 0x1b4   : > { %v543_v24 = vpop.permute.xlu1 %542  ;;  %v538_v25 = vpop.permute.xlu0 %537 }
 0x1b5   : > { %546 = vst.msk [vmem:[#allocation2 + $0x8] sm:$0xf] %vm532_vm2, %v543_v24  ;;  %541 = vst.msk [vmem:[#allocation2 + $0x4] sm:$0xf] %vm532_vm2, %v538_v25 }
 0x1b8   : > { %v575_v26 = vpop.permute.xlu0 %574 }
 0x1b9   : > { %1567 = vmatpush3.bf16.msra.mxu1 %v575_v26 }
 0x1ba   : > { %1568 = vmatprep.subr.bf16.mxu1 %v2043_v0 }
 0x1bc   : > { %v548_v27 = vpop.permute.xlu0 %547  ;;  %v716_v28 = vpop.permute.xlu1 %715  ;;  %v735_v29 = vld [vmem:[#allocation2 + $0x4] sm:$0xf]  ;;  %v736_v38 = vld [vmem:[#allocation2 + $0x8] sm:$0xf] }
 0x1bd   : > { %551 = vst.msk [vmem:[#allocation2 + $0xc] sm:$0xf] %vm532_vm2, %v548_v27  ;;  %719 = vst.msk [vmem:[#allocation4 + $0x4] sm:$0xf] %vm532_vm2, %v716_v28  ;;  %1569 = vmatpush3.bf16.msra.mxu1 %v573_v23  ;;  %v789_v30 = vsel %vm738_vm3, %v735_v29, 0  ;;  %v835_v40 = vsel %vm738_vm3, %v736_v38, 0 }
 0x1be   : > { %1589 = vmatpush3.bf16.xpose.msra.mxu0 %v789_v30  ;;  %1582 = vmatprep.subr.bf16.mxu1 %v2043_v0 }
 0x1bf   : > { %1600 = vmatprep.subr.bf16.mxu0 %v2043_v0 }
 0x1c0   : > { %1571 = vmatmul.mubr.msk.bf16.vlgmr.msra.gmra.mxu1 %vm487_vm1, %v2277_v3  ;;  %v721_v33 = vpop.permute.xlu0 %720  ;;  %v726_v34 = vpop.permute.xlu1 %725 }
 0x1c1   : > { %1583 = vmatpush3.bf16.xpose.msra.mxu1 %v743_v32  ;;  %724 = vst.msk [vmem:[#allocation4 + $0x8] sm:$0xf] %vm532_vm2, %v721_v33  ;;  %729 = vst.msk [vmem:[#allocation4 + $0xc] sm:$0xf] %vm532_vm2, %v726_v34  ;;  %1584 = vmatprep.mubr.msk.bf16.mxu1 %vm2044_vm0, %v2043_v0 }
 0x1c2   : > { %1594 = vmatprep.subr.bf16.mxu1 %v2043_v0 }
 0x1c4   : > { %v731_v35 = vld [vmem:[#allocation4 + $0x4] sm:$0xf]  ;;  %v737_v36 = vld [vmem:[#allocation2 + $0xc] sm:$0xf] }
 0x1c5   : > { %1591 = vmatmul.mubr.msk.bf16.vlgmr.msra.gmra.mxu0 %vm738_vm3, %v731_v35  ;;  %v881_v37 = vsel %vm738_vm3, %v737_v36, 0 }
 0x1c6   : > { %1601 = vmatpush3.bf16.xpose.msra.mxu0 %v881_v37  ;;  %1602 = vmatprep.mubr.msk.bf16.mxu0 %vm2044_vm0, %v2043_v0 }
 0x1c7   : > { %1612 = vmatprep.subr.bf16.mxu0 %v2043_v0 }
 0x1c8   : > { %1585 = vmatmul.mubr.msk.bf16.vlgmr.msra.gmra.mxu1 %vm738_vm3, %v730_v39  ;;  %v733_v41 = vld [vmem:[#allocation4 + $0xc] sm:$0xf]  ;;  %v732_v42 = vld [vmem:[#allocation4 + $0x8] sm:$0xf] }
 0x1c9   : > { %1595 = vmatpush3.bf16.xpose.msra.mxu1 %v835_v40  ;;  %1596 = vmatprep.mubr.msk.bf16.mxu1 %vm2044_vm0, %v2043_v0 }
 0x1ca   : > { %1606 = vmatprep.subr.bf16.mxu1 %v2043_v0 }
 0x1cd   : > { %1603 = vmatmul.mubr.msk.bf16.vlgmr.msra.gmra.mxu0 %vm738_vm3, %v733_v41 }
 0x1ce   : > { %1614 = vmatprep.mubr.msk.bf16.mxu0 %vm2044_vm0, %v2043_v0 }
 0x1d0   : > { %1597 = vmatmul.mubr.msk.bf16.vlgmr.msra.gmra.mxu1 %vm738_vm3, %v732_v42 }
 0x1d1   : > { %1608 = vmatprep.mubr.msk.bf16.mxu1 %vm2044_vm0, %v2043_v0 }
 0x280   : > { %v615_v43 = vpop.f32.mrf.mxu1 }
 0x282   : > { %v1572_v44 = vpop.f32.mrf.mxu1 }
 0x284   : > { %v618_v45 = vpop.f32.mrf.mxu1 }
 0x285   : > { %v825_v46 = vpop.f32.mrf.mxu0 }
 0x286   : > { %v1573_v47 = vpop.f32.mrf.mxu1  ;;  %v926_v48 = vsel %vm738_vm3, %v825_v46, -inf }
 0x287   : > { %927 = vmax.xlane.f32.xlu1 %v926_v48  ;;  %v1592_v49 = vpop.f32.mrf.mxu0 }
 0x288   : > { %v779_v50 = vpop.f32.mrf.mxu1 }
 0x289   : > { %v828_v51 = vpop.f32.mrf.mxu0  ;;  %v923_v52 = vsel %vm738_vm3, %v779_v50, -inf }
 0x28a   : > { %924 = vmax.xlane.f32.xlu0 %v923_v52  ;;  %v1586_v53 = vpop.f32.mrf.mxu1 }
 0x28b   : > { %v1593_v54 = vpop.f32.mrf.mxu0 }
 0x28c   : > { %v782_v55 = vpop.f32.mrf.mxu1 }
 0x28d   : > { %v917_v56 = vpop.f32.mrf.mxu0 }
 0x28e   : > { %v1587_v57 = vpop.f32.mrf.mxu1  ;;  %v932_v2 = vsel %vm738_vm3, %v917_v56, -inf }
 0x28f   : > { %v1604_v58 = vpop.f32.mrf.mxu0 }
 0x290   : > { %v871_v59 = vpop.f32.mrf.mxu1 }
 0x291   : > { %v920_v60 = vpop.f32.mrf.mxu0  ;;  %v929_v61 = vsel %vm738_vm3, %v871_v59, -inf }
 0x292   : > { %930 = vmax.xlane.f32.xlu0 %v929_v61  ;;  %v1598_v62 = vpop.f32.mrf.mxu1 }
 0x293   : > { %v1605_v63 = vpop.f32.mrf.mxu0 }
 0x294   : > { %v874_v1 = vpop.f32.mrf.mxu1  ;;  %v1761_v63 = vld [vmem:[#allocation14] sm:$0xff]  }
 0x296   : > { %v1599_v3 = vpop.f32.mrf.mxu1  ;;  %933 = vmax.xlane.f32.xlu0 %v932_v2 }
 0x298   : > { %578 = vrot.lane.b32.xlu1 %v2294_v8, %s2045_s15  ;;  %s2394_s15 = scalar_lea.hbm %s2487_s9, %s1529_s20 }
 0x310   : > { %v928_v4 = vpop.xlane.xlu1 %927 }
 0x311   : > { %v936_v5 = vsub.f32 %v825_v46, %v928_v4 }
 0x313   : > { %v925_v6 = vpop.xlane.xlu0 %924  ;;  %v941_v11 = vmul.f32 1.442695, %v936_v5 }
 0x314   : > { %v935_v7 = vsub.f32 %v779_v50, %v925_v6  ;;  %v579_v9 = vpop.permute.xlu1 %578 }
 0x315   : > { %v616_v10 = vadd.f32 %v615_v43, %v579_v9 }
 0x316   : > { %v939_v12 = vmul.f32 1.442695, %v935_v7 }
 0x317   : > { %v621_v13 = vpack.c.bf16 %v616_v10, %v616_v10 }
 0x318   : > { %1762 = vpow2.f32 %v939_v12 }
 0x319   : > { %622 = vst.msk [vmem:[#allocation3] sm:$0xf] %vm532_vm2, %v621_v13  ;;  %626 = vrot.lane.b32.xlu1 %v621_v13, %s2047_s30  ;;  %1764 = vpow2.f32 %v941_v11 }
 0x31b   : > { %v931_v14 = vpop.xlane.xlu0 %930 }
 0x31c   : > { %v937_v15 = vsub.f32 %v871_v59, %v931_v14  ;;  %v1760_v59 = vld [vmem:[#allocation14 + $0x8] sm:$0xff]  }
 0x31d   : > { %636 = vrot.lane.b32.xlu1 %v621_v13, %s2048_s28 }
 0x31e   : > { %v943_v8 = vmul.f32 1.442695, %v937_v15 }
 0x31f   : > { %v934_v16 = vpop.xlane.xlu0 %933 }
 0x320   : > { %1766 = vpow2.f32 %v943_v8  ;;  %v938_v17 = vsub.f32 %v917_v56, %v934_v16  ;;  %v979_v18 = vld [vmem:[#allocation3] sm:$0xf] }
 0x321   : > { %v988_v19 = vsel %vm986_vm4, %v979_v18, 0 }
 0x322   : > { %v945_v20 = vmul.f32 1.442695, %v938_v17  ;;  %1607 = vmatpush3.bf16.msra.mxu1 %v988_v19 }
 0x323   : > { %1618 = vmatprep.subr.bf16.mxu1 %v2043_v0 }
 0x324   : > { %1768 = vpow2.f32 %v945_v20 }
 0x325   : > { %v1763_v21 = vpop.eup %1762 }
 0x326   : > { %v947_v22 = vsel %vm738_vm3, %v1763_v21, 0.0  ;;  %v1765_v23 = vpop.eup %1764 }
 0x327   : > { %948 = vadd.xlane.f32.xlu0 %v947_v22  ;;  %v950_v24 = vsel %vm738_vm3, %v1765_v23, 0.0 }
 0x32b   : > { %951 = vadd.xlane.f32.xlu0 %v950_v24 }
 0x32d   : > { %v1767_v25 = vpop.eup %1766 }
 0x32e   : > { %v953_v26 = vsel %vm738_vm3, %v1767_v25, 0.0 }
 0x32f   : > { %954 = vadd.xlane.f32.xlu0 %v953_v26 }
 0x331   : > { %v1769_v27 = vpop.eup %1768 }
 0x332   : > { %v956_v28 = vsel %vm738_vm3, %v1769_v27, 0.0 }
 0x333   : > { %957 = vadd.xlane.f32.xlu0 %v956_v28 }
 0x349   : > { %631 = vrot.lane.b32.xlu0 %v621_v13, %s2046_s21  ;;  %s2052_s21 = smov [#allocation16]  }
 0x34a   : > { %s1916_s30 = sshll.u32 %s2052_s21, 4  ;;  %s1917_s30 = int_to_ptr.vmem [resolvable:$false] %s1916_s30 }
 0x34b   : > { %s1918_s18 = scalar_lea.vmem %s1917_s30, 512  ;;  %p1919_p11 = scmp.lt.s32.totalorder %s2396_s6, %s1917_s30 }
 0x34c   : > { %p1920_p9 = scmp.lt.s32.totalorder %s1918_s18, %s1912_s24 }
 0x34e   : > { %p1921_p13 = por %p1920_p9, %p1919_p11 }
 0x350   : > { %p1922_p2 = pnand %p1921_p13, %p1915_p10 }
 0x38b   : > { %v627_v29 = vpop.permute.xlu1 %626 }
 0x38c   : > { %630 = vst.msk [vmem:[#allocation3 + $0x4] sm:$0xf] %vm532_vm2, %v627_v29 }
 0x38f   : > { %v637_v30 = vpop.permute.xlu1 %636 }
 0x390   : > { %640 = vst.msk [vmem:[#allocation3 + $0xc] sm:$0xf] %vm532_vm2, %v637_v30 }
 0x393   : > { %v980_v31 = vld [vmem:[#allocation3 + $0x4] sm:$0xf] }
 0x394   : > { %v1034_v32 = vsel %vm986_vm4, %v980_v31, 0 }
 0x395   : > { %1613 = vmatpush3.bf16.msra.mxu0 %v1034_v32 }
 0x396   : > { %1624 = vmatprep.subr.bf16.mxu0 %v2043_v0 }
 0x397   : > { %v982_v43 = vld [vmem:[#allocation3 + $0xc] sm:$0xf] }
 0x398   : > { %v1126_v46 = vsel %vm986_vm4, %v982_v43, 0 }
 0x3b0   : > { %v949_v33 = vpop.xlane.xlu0 %948 }
 0x3b1   : > { %1770 = vrcp.f32 %v949_v33 }
 0x3b4   : > { %v952_v34 = vpop.xlane.xlu0 %951 }
 0x3b5   : > { %1772 = vrcp.f32 %v952_v34 }
 0x3b8   : > { %v955_v35 = vpop.xlane.xlu0 %954 }
 0x3b9   : > { %1774 = vrcp.f32 %v955_v35 }
 0x3bc   : > { %v958_v36 = vpop.xlane.xlu0 %957 }
 0x3bd   : > { %1776 = vrcp.f32 %v958_v36 }
 0x3be   : > { %v1771_v37 = vpop.eup %1770 }
 0x3bf   : > { %v967_v38 = vmul.f32 %v1771_v37, %v1763_v21 }
 0x3c0   : > { %v632_v39 = vpop.permute.xlu0 %631 }
 0x3c1   : > { %635 = vst.msk [vmem:[#allocation3 + $0x8] sm:$0xf] %vm532_vm2, %v632_v39  ;;  %v971_v40 = vpack.c.bf16 %v967_v38, %v967_v38 }
 0x3c2   : > { %v1773_v41 = vpop.eup %1772 }
 0x3c3   : > { %975 = vst.msk [vmem:[%s2363_s16] sm:$0xf] %vm532_vm2, %v971_v40  ;;  %1609 = vmatmul.mubr.msk.bf16.vlgmr.msra.gmra.mxu1 %vm738_vm3, %v971_v40  ;;  %v968_v42 = vmul.f32 %v1773_v41, %v1765_v23 }
 0x3c4   : > { %1620 = vmatprep.mubr.msk.bf16.mxu1 %vm2044_vm0, %v2043_v0 }
 0x3c5   : > { %v972_v44 = vpack.c.bf16 %v968_v42, %v968_v42 }
 0x3c6   : > { %v1775_v45 = vpop.eup %1774 }
 0x3c7   : > { %976 = vst.msk [vmem:[%s2363_s16 + $0x4] sm:$0xf] %vm532_vm2, %v972_v44  ;;  %1615 = vmatmul.mubr.msk.bf16.vlgmr.msra.gmra.mxu0 %vm738_vm3, %v972_v44  ;;  %v969_v47 = vmul.f32 %v1775_v45, %v1767_v25 }
 0x3c8   : > { %1625 = vmatpush3.bf16.msra.mxu0 %v1126_v46  ;;  %v981_v48 = vld [vmem:[#allocation3 + $0x8] sm:$0xf]  ;;  %1626 = vmatprep.mubr.msk.bf16.mxu0 %vm2044_vm0, %v2043_v0 }
 0x3c9   : > { %v1080_v49 = vsel %vm986_vm4, %v981_v48, 0  ;;  %v973_v50 = vpack.c.bf16 %v969_v47, %v969_v47 }
 0x3ca   : > { %v1777_v51 = vpop.eup %1776  ;;  %1619 = vmatpush3.bf16.msra.mxu1 %v1080_v49 }
 0x3cb   : > { %977 = vst.msk [vmem:[%s2363_s16 + $0x8] sm:$0xf] %vm532_vm2, %v973_v50  ;;  %v970_v52 = vmul.f32 %v1777_v51, %v1769_v27  ;;  %1630 = vmatprep.subr.bf16.mxu1 %v2043_v0 }
 0x3cd   : > { %1621 = vmatmul.mubr.msk.bf16.vlgmr.msra.gmra.mxu1 %vm738_vm3, %v973_v50  ;;  %v974_v53 = vpack.c.bf16 %v970_v52, %v970_v52 }
 0x3ce   : > { %1634 = vmatprep.mubr.msk.bf16.mxu1 %vm2044_vm0, %v2043_v0  ;;  %1631 = vmatpush3.bf16.msra.mxu1 %v1760_v59 }
 0x3cf   : > { %978 = vst.msk [vmem:[%s2363_s16 + $0xc] sm:$0xf] %vm532_vm2, %v974_v53  ;;  %1627 = vmatmul.mubr.msk.bf16.vlgmr.msra.gmra.mxu0 %vm738_vm3, %v974_v53  ;;  %1632 = vmatprep.subr.bf16.mxu1 %v2043_v0 }
 0x3d2   : > { %1633 = vmatpush3.bf16.msra.mxu1 %v1761_v63 }
 0x483   : > { %v1024_v54 = vpop.f32.mrf.mxu1 }
 0x484   : > { %v1168_v55 = vpack.c.bf16 %v1024_v54, %v1024_v54 }
 0x485   : > { %v1610_v56 = vpop.f32.mrf.mxu1 }
 0x486   : > { %1169 = vst.msk [vmem:[#allocation5] sm:$0xf] %vm532_vm2, %v1168_v55 }
 0x487   : > { %v1027_v57 = vpop.f32.mrf.mxu1  ;;  %v1070_v58 = vpop.f32.mrf.mxu0 }
 0x488   : > { %v1526_v60 = vpack.c.bf16 %v1070_v58, %v1070_v58 }
 0x489   : > { %v1611_v61 = vpop.f32.mrf.mxu1  ;;  %v1616_v62 = vpop.f32.mrf.mxu0 }
 0x48a   : > { %1174 = vrot.lane.b32.xlu1 %v1526_v60, %s2049_s0 }
 0x48b   : > { %v1073_v1 = vpop.f32.mrf.mxu0 }
 0x48d   : > { %v1617_v2 = vpop.f32.mrf.mxu0  ;;  %v1116_v3 = vpop.f32.mrf.mxu1 }
 0x48e   : > { %v1527_v4 = vpack.c.bf16 %v1116_v3, %v1116_v3 }
 0x48f   : > { %v1622_v5 = vpop.f32.mrf.mxu1  ;;  %v1162_v6 = vpop.f32.mrf.mxu0 }
 0x490   : > { %1183 = vrot.lane.b32.xlu1 %v1527_v4, %s2050_s23  ;;  %v1528_v10 = vpack.c.bf16 %v1162_v6, %v1162_v6 }
 0x491   : > { %v1119_v7 = vpop.f32.mrf.mxu1  ;;  %v1628_v9 = vpop.f32.mrf.mxu0 }
 0x493   : > { %v1623_v11 = vpop.f32.mrf.mxu1  ;;  %v1165_v12 = vpop.f32.mrf.mxu0 }
 0x494   : > { %1192 = vrot.lane.b32.xlu1 %v1528_v10, %s2051_s26 }
 0x495   : > { %v1629_v13 = vpop.f32.mrf.mxu0 }
 0x4fc   : > { %v1175_v0 = vpop.permute.xlu1 %1174 }
 0x4fd   : > { %1178 = vst.msk [vmem:[#allocation5] sm:$0xf] %vm1177_vm5, %v1175_v0 }
 0x502   : > { %v1184_v14 = vpop.permute.xlu1 %1183 }
 0x503   : > { %1187 = vst.msk [vmem:[#allocation5] sm:$0xf] %vm1186_vm6, %v1184_v14 }
 0x506   : > { %v1193_v15 = vpop.permute.xlu1 %1192 }
 0x507   : > { %1196 = vst.msk [vmem:[#allocation5] sm:$0xf] %vm1195_vm7, %v1193_v15 }
 0x50e   : > { %v1197_v8 = vld [vmem:[#allocation5] sm:$0xf] }
 0x50f   : > { %1635 = vmatmul.mubr.msk.bf16.vlgmr.msra.gmra.mxu1 %vm487_vm1, %v1197_v8 }
 0x510   : > { %1925 = shalt.err (!%p1922_p2)
}
 0x511   : > { %s1926_s25 = scalar_lea.hbm %s2394_s15, 256  ;;  %s1930_s16 = scalar_lea.hbm %s2487_s9, 512 }
 0x512   : > { %p1927_p4 = scmp.ne.s32.totalorder %s2394_s15, %s1926_s25  ;;  %p1931_p7 = scmp.lt.s32.totalorder %s2394_s15, %s2487_s9 }
 0x513   : > { %p1932_p6 = scmp.lt.s32.totalorder %s1930_s16, %s1926_s25 }
 0x514   : > { %p1928_p1 = pnand %p1927_p4, %p2202_p5 }
 0x515   : > { %p1933_p12 = por %p1932_p6, %p1931_p7 }
 0x516   : > { %p1929_p8 = pneg %p1928_p1 }
 0x518   : > { %p1934_p0 = pnand %p1933_p12, %p1929_p8 }
 0x51a   : > { %1937 = shalt.err (!%p1934_p0)
}
 0x51b   : > { %s2053_s26 = smov 64   ;;  %s2054_s20 = smov 4   ;;  %v1512_v16 = vld [vmem:[%s2485_s7] ss:$0 sm:$0xff] }
 0x51c   : > { %1655 = dma.vmem_to_hbm [thread:$0]  (%p2202_p5), %s2396_s6, 256, %s2394_s15, %s1271_s17, %s2053_s26, %s2053_s26, %s2054_s20  }
 0x51d   : > { %s1484_s19 = sshll.u32 %s2247_s4, 3  ;;  %s1518_s21 = sshll.u32 %s2026_s12, 7 }
 0x51e   : > { %s450_s30 = scalar_lea.vmem [#allocation15], %s1484_s19  ;;  %s2429_s2 = scalar_lea.hbm %s2486_s8, %s1518_s21 }
 0x51f   : > { %s1285_s18 = sshll.u32 %s450_s30, 4  ;;  %s1266_s6 = scalar_lea.sflag [#allocation8], %s2247_s4  ;;  %s2431_s18 = int_to_ptr.vmem [resolvable:$true] %s1285_s18 }
 0x520   : > { %s1938_s12 = scalar_lea.vmem %s2431_s18, 128  ;;  %s2055_s15 = smov [#allocation15]  }
 0x521   : > { %p1939_p3 = scmp.ne.s32.totalorder %s2431_s18, %s1938_s12  ;;  %s1942_s17 = sshll.u32 %s2055_s15, 4  ;;  %s1943_s17 = int_to_ptr.vmem [resolvable:$false] %s1942_s17 }
 0x522   : > { %s1944_s16 = scalar_lea.vmem %s1943_s17, 256  ;;  %p1945_p9 = scmp.lt.s32.totalorder %s2431_s18, %s1943_s17 }
 0x523   : > { %p1940_p10 = pnand %p1939_p3, %p2202_p5  ;;  %p1946_p13 = scmp.lt.s32.totalorder %s1944_s16, %s1938_s12 }
 0x525   : > { %p1941_p11 = pneg %p1940_p10  ;;  %p1947_p2 = por %p1946_p13, %p1945_p9 }
 0x527   : > { %p1948_p4 = pnand %p1947_p2, %p1941_p11 }
 0x5cf   : > { %v1258_v17 = vpop.f32.mrf.mxu1 }
 0x5d0   : > { %v1259_v18 = vadd.f32 %v1512_v16, %v1258_v17 }
 0x5d1   : > { %v1636_v19 = vpop.f32.mrf.mxu1 }
 0x5d2   : > { %1264 = vst.msk [vmem:[%s450_s30] sm:$0xff] %vm487_vm1, %v1259_v18 }
 0x5d3   : > { %v1261_v20 = vpop.f32.mrf.mxu1 }
 0x5d4   : > { %1951 = shalt.err (!%p1948_p4)
}
 0x5d5   : > { %s1952_s0 = scalar_lea.hbm %s2429_s2, 128  ;;  %s1956_s26 = scalar_lea.hbm %s2486_s8, 256 }
 0x5d6   : > { %p1953_p1 = scmp.ne.s32.totalorder %s2429_s2, %s1952_s0  ;;  %p1957_p6 = scmp.lt.s32.totalorder %s2429_s2, %s2486_s8 }
 0x5d7   : > { %p1958_p12 = scmp.lt.s32.totalorder %s1956_s26, %s1952_s0 }
 0x5d8   : > { %p1954_p8 = pnand %p1953_p1, %p2202_p5 }
 0x5d9   : > { %p1959_p0 = por %p1958_p12, %p1957_p6 }
 0x5da   : > { %p1955_p7 = pneg %p1954_p8 }
 0x5dc   : > { %p1960_p3 = pnand %p1959_p0, %p1955_p7 }
 0x5de   : > { %1963 = shalt.err (!%p1960_p3)
}
 0x5df   : > { %1654 = dma.vmem_to_hbm [thread:$0]  (%p2202_p5), %s2431_s18, 128, %s2429_s2, %s1266_s6   ;;  %v1637_v21 = vpop.f32.mrf.mxu1 }
 0x5e0 PF: > { %s2516_s27 = sld [smem:[#allocation24_spill]]  ;;  %p2519_p11 = scmp.ge.s32.totalorder %s2034_s14, 2 }
 0x5e1   : > { %s2517_s24 = sld [smem:[#allocation25_spill]] }
 0x5e6   : > { %s1314_s21 = sand.u32 1, %s2516_s27  }
 0x5e7   : > { %p2518_p10 = scmp.ne.s32.totalorder %s2517_s24, 0  ;;  %s1315_s30 = scalar_lea.sflag [#allocation8], %s1314_s21 }
 0x5e9   : > { %p1676_p9 = pnand %p2519_p11, %p2518_p10 }
 0x5eb   : > { %p1677_p13 = pneg %p1676_p9 }
 0x5ed   : > { %2005 = dma.done.wait (%p1677_p13), %s1315_s30, 128  }
 0x5ee   : > { %2007 = vsyncadd (%p1677_p13), %s1315_s30, 4294967168  ;;  %s1324_s25 = scalar_lea.sflag [#allocation17], %s1314_s21 }
 0x5ef   : > { %2009 = dma.done.wait (%p1677_p13), %s1324_s25, 256  }
 0x5f0   : > { %2011 = vsyncadd (%p1677_p13), %s1324_s25, 4294967040  ;;  %s33_s14 = sadd.s32 1, %s2034_s14   ;;  %s2520_s22 = sld [smem:[#allocation26_spill]] }
 0x5f1   : > { %p30_p2 = scmp.ge.s32.totalorder %s33_s14, 4   ;;  %s2521_s30 = smov %s2018_s10 }
 0x5f2   : > { %s2522_s10 = smov %s2022_s11  ;;  %s2523_s11 = smov %s2214_s29 }
 0x5f3   : > { %s2524_s12 = smov %s2030_s13  ;;  %32 = sbr.rel (!%p30_p2) target bundleno = 16 (0x10), region = 152 }
 0x5f6   : > { %s2525_s13 = smov %s2520_s22 }
 0x5f8   :  { %1329 = vsyncpa [#allocation7], 1 }
 0x5f9   :  { %1331 = vsyncpa [#allocation7 + $0x1], 1 }
 0x5fa   :  { %1332 = vsyncpa [#allocation10], 1 }
 0x5fb   :  { %1334 = vsyncpa [#allocation10 + $0x1], 1 }
 0x5fc   :  { %1335 = vsyncpa [#allocation13], 1 }
 0x5fd   :  { %1336 = vsyncpa [#allocation8], 1 }
 0x5fe   :  { %1338 = vsyncpa [#allocation8 + $0x1], 1 }
 0x5ff   :  { %1339 = vsyncpa [#allocation17], 1 }
 0x600   :  { %1341 = vsyncpa [#allocation17 + $0x1], 1 }

</bundles_post_ra>
